<compile_context>
chip_gen: v6e
topology: v6e:2x2x1
jax: 0.10.0
libtpu: 0.0.40
codegen_flags: <defaults>
</compile_context>

<pallas_src>
import functools
import math

import jax
import jax.numpy as jnp
from jax.experimental import pallas as pl
from jax.experimental.pallas import tpu as pltpu


# --------------------------------------------------------------------------- #
# Kernel
# --------------------------------------------------------------------------- #
def _project_readout_kernel(x_ref, w_ref, b_ref, out_ref, *,
                            start_index, tile_rows, compute_dtype,
                            approximate_gelu):
    # x_ref  : (N, C)   full token slab of one batch element (incl. readout)
    # w_ref  : (2C, C)  [W1; W2] (torch weight transposed)
    # b_ref  : (1, C)   bias (f32)
    # out_ref: (tile_rows, C)
    c = out_ref.shape[-1]
    j = pl.program_id(1)
    row0 = start_index + j * tile_rows

    tok = x_ref[pl.ds(row0, tile_rows), :]        # (tile_rows, C) patch tokens
    cls = x_ref[0:1, :]                           # (1, C) readout token
    w1 = w_ref[0:c, :]                            # applied to patch tokens
    w2 = w_ref[c:2 * c, :]                        # applied to readout token

    if compute_dtype is not None:
        tok = tok.astype(compute_dtype)
        cls = cls.astype(compute_dtype)           # weight pre-cast in wrapper

    acc = jnp.dot(tok, w1, preferred_element_type=jnp.float32)
    ro = jnp.dot(cls, w2, preferred_element_type=jnp.float32)
    y = acc + (ro + b_ref[...])                   # (1, C) broadcast over rows

    if approximate_gelu:
        # tanh-GELU: transcendental routes to the EUP slot (VALU relief).
        out = jax.nn.gelu(y, approximate=True)
    else:
        # Exact GELU — matches torch.nn.GELU default.
        out = 0.5 * y * (1.0 + jax.lax.erf(y * jnp.float32(1.0 / math.sqrt(2.0))))
    out_ref[...] = out.astype(out_ref.dtype)


# --------------------------------------------------------------------------- #
# Host-side helpers
# --------------------------------------------------------------------------- #
def _vmem_capacity_bytes():
    """Per-TensorCore VMEM capacity; conservative (v7x) fallback."""
    try:
        info = pltpu.get_tpu_info()
        cap = int(getattr(info, "vmem_capacity_bytes", 0))
        if cap > 0:
            return cap
    except Exception:
        pass
    return 64 << 20


def _pick_token_tile(T, B, max_rows):
    """Largest token tile that (a) fits `max_rows`, (b) tiles T exactly
    (full extent, or a multiple-of-8 divisor), preferring a choice that
    yields >= 4 total grid steps so both v7x TensorCores get work."""
    cands = []
    if T <= max_rows:
        cands.append(T)                               # full-extent tile
    d = (T // 8) * 8
    while d >= 8:
        if d < T and T % d == 0 and d <= max_rows:
            cands.append(d)                           # multiple-of-8 divisor
        d -= 8
    if not cands:
        return None
    for tt in cands:                                  # descending tile size
        if B * (-(-T // tt)) >= 4:
            return tt
    return cands[0]


# --------------------------------------------------------------------------- #
# Wrapper
# --------------------------------------------------------------------------- #
@functools.partial(jax.jit, static_argnames=("start_index", "compute_dtype",
                                              "approximate_gelu", "out_dtype"))
def project_readout(x, weight, bias, *, start_index=1,
                    compute_dtype=jnp.bfloat16, approximate_gelu=False,
                    out_dtype=None):
    """ProjectReadout forward.

    x:      (B, N, C) activations (N tokens incl. the readout/CLS token).
    weight: (2C, C)   Linear weight, already transposed vs torch's (out, in).
    bias:   (C,)      Linear bias.
    Returns (B, N - start_index, C) in `out_dtype` (default: x.dtype).
    """
    B, N, C = x.shape
    T = N - start_index
    out_dtype = x.dtype if out_dtype is None else out_dtype

    w = weight if compute_dtype is None else weight.astype(compute_dtype)
    b2d = bias.astype(jnp.float32).reshape(1, C)

    x_item = jnp.dtype(x.dtype).itemsize
    w_item = jnp.dtype(w.dtype).itemsize
    o_item = jnp.dtype(out_dtype).itemsize

    # ---- VMEM budgeting (generation-aware) ----------------------------------
    vmem_cap = _vmem_capacity_bytes()
    budget = min(int(0.7 * vmem_cap), vmem_cap - (12 << 20))
    # Per-step residents.  Weight/bias are grid-invariant (fetched once by the
    # pipeline); they are still charged at 2 buffers to keep the estimate
    # honest.  NOTE: pipeline_mode=pl.Buffered(1) could shave that buffer but
    # is skipped here for maximum compile portability.
    fixed = 2 * N * C * x_item + 2 * (2 * C) * C * w_item + 2 * C * 4
    per_row = C * (2 * o_item + 3 * 4)     # out (x2 buffers) + f32 acc/GELU temps
    max_rows = max(8, (budget - fixed) // per_row) if budget > fixed else 8
    # TODO(synk): for very long sequences the per-batch (N, C) slab itself can
    # outgrow VMEM; that would need a token-tiled HBM read (pl.Element offsets
    # or a manual DMA), which LSeg ViT shapes (N <= ~1400) never hit.

    tt = _pick_token_tile(T, B, max_rows)
    if tt is None:
        # Rare fallback (T too large for one tile and not a multiple of 8):
        # pad the token axis and slice the result (one extra HBM round trip).
        tt = max(8, (min(max_rows, 1024) // 8) * 8)
        n_tiles = -(-T // tt)
        t_out = n_tiles * tt
        x_in = jnp.pad(x, ((0, 0), (0, start_index + t_out - N), (0, 0)))
    else:
        n_tiles = T // tt
        t_out = T
        x_in = x
    n_in = x_in.shape[1]

    fixed = 2 * n_in * C * x_item + 2 * (2 * C) * C * w_item + 2 * C * 4
    vmem_limit = int(min(max(fixed + tt * per_row + (8 << 20), 32 << 20),
                         vmem_cap))

    kernel = functools.partial(
        _project_readout_kernel, start_index=start_index, tile_rows=tt,
        compute_dtype=compute_dtype, approximate_gelu=approximate_gelu)

    out = pl.pallas_call(
        kernel,
        grid=(B, n_tiles),
        in_specs=[
            pl.BlockSpec((None, n_in, C), lambda bi, ji: (bi, 0, 0)),  # x slab
            pl.BlockSpec((2 * C, C), lambda bi, ji: (0, 0)),           # weight
            pl.BlockSpec((1, C), lambda bi, ji: (0, 0)),               # bias
        ],
        out_specs=pl.BlockSpec((None, tt, C), lambda bi, ji: (bi, ji, 0)),
        out_shape=jax.ShapeDtypeStruct((B, t_out, C), out_dtype),
        compiler_params=pltpu.CompilerParams(
            dimension_semantics=("parallel", "parallel"),
            vmem_limit_bytes=vmem_limit),
    )(x_in, w, b2d)

    return out if t_out == T else out[:, :T, :]


# --------------------------------------------------------------------------- #
# Reference + self-test
# --------------------------------------------------------------------------- #
def _reference(x, weight, bias, start_index=1):
    tokens = x[:, start_index:, :]
    readout = jnp.broadcast_to(x[:, 0:1, :], tokens.shape)
    cat = jnp.concatenate([tokens, readout], axis=-1)
    y = cat @ weight + bias
    return 0.5 * y * (1.0 + jax.lax.erf(y / jnp.sqrt(2.0)))


if __name__ == "__main__":
    key = jax.random.PRNGKey(0)

    def _make(B, N, C, salt):
        kx, kw, kb = jax.random.split(jax.random.fold_in(key, salt), 3)
        x = jax.random.normal(kx, (B, N, C), dtype=jnp.float32)
        bound = 1.0 / math.sqrt(2 * C)
        weight = jax.random.uniform(kw, (2 * C, C), jnp.float32, -bound, bound)
        bias = jax.random.uniform(kb, (C,), jnp.float32, -bound, bound)
        return x, weight, bias

    def _check(B, N, C, salt, tol, **kw):
        x, weight, bias = _make(B, N, C, salt)
        out = jax.block_until_ready(project_readout(x, weight, bias, **kw))
        ref = _reference(x, weight, bias, start_index=kw.get("start_index", 1))
        assert out.shape == ref.shape, (out.shape, ref.shape)
        err = jnp.max(jnp.abs(out.astype(jnp.float32) - ref))
        assert jnp.allclose(out.astype(jnp.float32), ref, rtol=tol, atol=tol), float(err)

    # Default path: bf16 MXU operands (f32 accumulation), exact-erf GELU.
    _check(2, 9, 32, salt=0, tol=5e-2)                 # 1 cls + 8 tokens
    # Ragged token count (T=14, not a multiple of 8): full-extent tile, no pad.
    _check(2, 15, 32, salt=1, tol=5e-2)
    # Multi-tile path (T=32 -> 2 tiles of 16): exercises the dynamic in-VMEM
    # token offset and the >=4-grid-steps heuristic.
    _check(2, 33, 32, salt=2, tol=5e-2)
    # Exact f32 parity with torch (nn.Linear + exact-erf nn.GELU).
    _check(2, 33, 32, salt=3, tol=1e-4, compute_dtype=None)
    # Tanh-GELU (EUP) variant — looser tolerance vs the exact reference.
    _check(2, 33, 32, salt=4, tol=2e-2, compute_dtype=None, approximate_gelu=True)

    print("KERNEL_OK")
</pallas_src>

<mosaic_0001>
module attributes {stable_mosaic.version = 11 : i64} {
  func.func @_project_readout_kernel(%arg0: i32, %arg1: i32, %arg2: memref<1x9x32xf32, #tpu.memory_space<vmem>>, %arg3: memref<64x32xbf16, #tpu.memory_space<vmem>>, %arg4: memref<1x32xf32, #tpu.memory_space<vmem>>, %arg5: memref<1x8x32xf32, #tpu.memory_space<vmem>>) attributes {dimension_semantics = [#tpu.dimension_semantics<parallel>, #tpu.dimension_semantics<parallel>], iteration_bounds = array<i64: 2, 1>, scalar_prefetch = 0 : i64, scratch_operands = 0 : i64, tpu.core_type = #tpu.core_type<tc>, window_params = [{transform_indices = @transform_0, window_bounds = array<i64: 1, 9, 32>}, {pipeline_mode = #tpu.pipeline_mode<synchronous>, transform_indices = @transform_1, window_bounds = array<i64: 64, 32>}, {pipeline_mode = #tpu.pipeline_mode<synchronous>, transform_indices = @transform_2, window_bounds = array<i64: 1, 32>}, {transform_indices = @transform_3, window_bounds = array<i64: 1, 8, 32>}]} {
    %c8_i32 = arith.constant 8 : i32
    %0 = arith.muli %arg1, %c8_i32 : i32
    %c1_i32 = arith.constant 1 : i32
    %1 = arith.addi %c1_i32, %0 : i32
    %c0 = arith.constant 0 : index
    %2 = arith.index_cast %1 : i32 to index
    %c0_0 = arith.constant 0 : index
    %3 = vector.load %arg2[%c0, %2, %c0_0] : memref<1x9x32xf32, #tpu.memory_space<vmem>>, vector<1x8x32xf32>
    %4 = vector.shape_cast %3 : vector<1x8x32xf32> to vector<8x32xf32>
    %c0_1 = arith.constant 0 : index
    %c0_2 = arith.constant 0 : index
    %c0_3 = arith.constant 0 : index
    %5 = vector.load %arg2[%c0_1, %c0_2, %c0_3] : memref<1x9x32xf32, #tpu.memory_space<vmem>>, vector<1x1x32xf32>
    %6 = vector.shape_cast %5 : vector<1x1x32xf32> to vector<1x32xf32>
    %c0_4 = arith.constant 0 : index
    %c0_5 = arith.constant 0 : index
    %7 = vector.load %arg3[%c0_4, %c0_5] : memref<64x32xbf16, #tpu.memory_space<vmem>>, vector<32x32xbf16>
    %c32 = arith.constant 32 : index
    %c0_6 = arith.constant 0 : index
    %8 = vector.load %arg3[%c32, %c0_6] : memref<64x32xbf16, #tpu.memory_space<vmem>>, vector<32x32xbf16>
    %9 = arith.truncf %4 : vector<8x32xf32> to vector<8x32xbf16>
    %10 = arith.truncf %6 : vector<1x32xf32> to vector<1x32xbf16>
    %cst = arith.constant dense<0.000000e+00> : vector<8x32xf32>
    %11 = tpu.matmul %9, %7, %cst {dimension_numbers = #tpu.dot_dimension_numbers<[1], [0], [0], [1], [0, 0, 1, 1], [], []>} : vector<8x32xbf16>, vector<32x32xbf16>, vector<8x32xf32> -> vector<8x32xf32>
    %cst_7 = arith.constant dense<0.000000e+00> : vector<1x32xf32>
    %12 = tpu.matmul %10, %8, %cst_7 {dimension_numbers = #tpu.dot_dimension_numbers<[1], [0], [0], [1], [0, 0, 1, 1], [], []>} : vector<1x32xbf16>, vector<32x32xbf16>, vector<1x32xf32> -> vector<1x32xf32>
    %c0_8 = arith.constant 0 : index
    %c0_9 = arith.constant 0 : index
    %13 = vector.load %arg4[%c0_8, %c0_9] : memref<1x32xf32, #tpu.memory_space<vmem>>, vector<1x32xf32>
    %14 = arith.addf %12, %13 : vector<1x32xf32>
    %15 = vector.broadcast %14 : vector<1x32xf32> to vector<8x32xf32>
    %16 = arith.addf %11, %15 : vector<8x32xf32>
    %cst_10 = arith.constant 5.000000e-01 : f32
    %17 = vector.broadcast %cst_10 : f32 to vector<8x32xf32>
    %18 = arith.mulf %17, %16 : vector<8x32xf32>
    %cst_11 = arith.constant 0.707106769 : f32
    %19 = vector.broadcast %cst_11 : f32 to vector<8x32xf32>
    %20 = arith.mulf %16, %19 : vector<8x32xf32>
    %21 = math.erf %20 : vector<8x32xf32>
    %cst_12 = arith.constant 1.000000e+00 : f32
    %22 = vector.broadcast %cst_12 : f32 to vector<8x32xf32>
    %23 = arith.addf %22, %21 : vector<8x32xf32>
    %24 = arith.mulf %18, %23 : vector<8x32xf32>
    %c0_13 = arith.constant 0 : index
    %c0_14 = arith.constant 0 : index
    %c0_15 = arith.constant 0 : index
    %25 = vector.load %arg5[%c0_13, %c0_14, %c0_15] : memref<1x8x32xf32, #tpu.memory_space<vmem>>, vector<1x8x32xf32>
    %26 = vector.shape_cast %25 : vector<1x8x32xf32> to vector<8x32xf32>
    %27 = vector.shape_cast %24 : vector<8x32xf32> to vector<1x8x32xf32>
    tpu.vector_store %arg5[%c0_13, %c0_14, %c0_15], %27 {strides = array<i32>} : memref<1x8x32xf32, #tpu.memory_space<vmem>>, vector<1x8x32xf32>,
    return
  }
  func.func @transform_0(%arg0: i32, %arg1: i32) -> (i32, i32, i32) {
    %c0_i32 = arith.constant 0 : i32
    %c0_i32_0 = arith.constant 0 : i32
    %c0_i32_1 = arith.constant 0 : i32
    return %arg0, %c0_i32, %c0_i32_0 : i32, i32, i32
  }
  func.func @transform_1(%arg0: i32, %arg1: i32) -> (i32, i32) {
    %c0_i32 = arith.constant 0 : i32
    %c0_i32_0 = arith.constant 0 : i32
    %c0_i32_1 = arith.constant 0 : i32
    return %c0_i32, %c0_i32_0 : i32, i32
  }
  func.func @transform_2(%arg0: i32, %arg1: i32) -> (i32, i32) {
    %c0_i32 = arith.constant 0 : i32
    %c0_i32_0 = arith.constant 0 : i32
    %c0_i32_1 = arith.constant 0 : i32
    return %c0_i32, %c0_i32_0 : i32, i32
  }
  func.func @transform_3(%arg0: i32, %arg1: i32) -> (i32, i32, i32) {
    %c0_i32 = arith.constant 0 : i32
    %c0_i32_0 = arith.constant 0 : i32
    return %arg0, %arg1, %c0_i32 : i32, i32, i32
  }
}

</mosaic_0001>

<bundles_post_ra>
// kernel: project_readout.1
= control target key start
LH: loop header
LB: loop body
LE: loop exit
PB: predicated region body
PF: predicated region fallthrough
CT: control target
= control target key end

     0   :  { %8 = vsyncpa [#allocation3], 0  ;;  %s730_s0 = inlined_call_operand.vmem [shape: f32[2,9,32], index: 0, kind: input, shape index: {}]   ;;  %s731_s1 = inlined_call_operand.vmem [shape: bf16[64,32], index: 1, kind: input, shape index: {}]   ;;  %s732_s2 = inlined_call_operand.vmem [shape: f32[1,32], index: 2, kind: input, shape index: {}]   ;;  %s733_s3 = inlined_call_operand.hbm [shape: f32[2,8,32], index: 3, kind: output, shape index: {}]  }
   0x1   :  { %10 = vsyncpa [#allocation3 + $0x1], 0  ;;  %s613_s12 = smov 0   ;;  %s615_s13 = smov 0  }
   0x2   :  { %s617_s14 = smov 0   ;;  %s619_s15 = smov 0  }
   0x3   :  { %s621_s16 = smov 0   ;;  %s623_s17 = smov 0  }
   0x4 LB: > { %s407_s18 = sadd.s32 4294967295, %s588_s17   ;;  %s408_s19 = sadd.s32 4294967294, %s588_s17   ;;  %s588_s17 = sphi %s623_s17, %s16_s17   ;;  %s584_s16 = sphi %s621_s16, %s740_s16   ;;  %s580_s15 = sphi %s619_s15, %s739_s15   ;;  %s576_s14 = sphi %s617_s14, %s738_s14   ;;  %s572_s13 = sphi %s615_s13, %s737_s13   ;;  %s568_s12 = sphi %s613_s12, %s736_s12  }
   0x5   : > { %s28_s20 = sadd.s32 1, %s584_s16  ;;  %s105_s21 = sadd.s32 1, %s576_s14 }
   0x6   : > { %p30_p0 = scmp.ge.s32.totalorder %s28_s20, 2  ;;  %p115_p1 = scmp.ne.s32.totalorder %s576_s14, %s572_s13 }
   0x7   : > { %p116_p2 = scmp.eq.s32.totalorder %s407_s18, 1  ;;  %p121_p3 = scmp.ne.s32.totalorder %s572_s13, %s568_s12 }
   0x8   : > { %s742_s20 = smov (%p30_p0, %s28_s20), 0  ;;  %p122_p5 = scmp.eq.s32.totalorder %s408_s19, 1 }
   0x9   : > { %p653_p4 = por %p116_p2, %p115_p1  ;;  %s100_s23 = ssub.s32 %s584_s16, %s742_s20 }
   0xa   : > { %p411_p6 = scmp.ge.s32.totalorder %s588_s17, 1  ;;  %p103_p7 = scmp.eq.s32.totalorder %s100_s23, 0 }
   0xb   : > { %p660_p8 = por %p122_p5, %p121_p3  ;;  %p154_p9 = scmp.lt.s32.totalorder %s588_s17, 3 }
   0xc   : > { %s666_s25 = scalar_select %p103_p7, %s576_s14, %s105_s21  }
   0xd   : > { %p155_p10 = pnand %p411_p6, %p154_p9 }
   0xe   : > { %p178_p11 = scmp.lt.s32.totalorder (!%p155_p10), %s580_s15, 1  ;;  %s175_s21 = sand.u32 (!%p155_p10), 1, %s572_s13  }
   0xf   : > { %158 = sbr.rel (%p155_p10) target bundleno = 261 (0x105), region = 32  ;;  %s412_s23 = sshll.u32 (!%p155_p10), %s175_s21, 3 }
  0x10   : > { %s423_s26 = sshll.u32 (!%p155_p10), %s580_s15, 7  ;;  %s177_s27 = scalar_lea.vmem (!%p155_p10), [#allocation2], %s412_s23 }
  0x11   : > { %s336_s28 = sshll.u32 (!%p155_p10), %s177_s27, 4  ;;  %s334_s4 = scalar_lea.hbm (!%p155_p10), %s733_s3, %s423_s26  ;;  %s337_s28 = int_to_ptr.vmem [resolvable:$true] %s336_s28 }
  0x12   : > { %s322_s5 = scalar_lea.sflag (!%p155_p10), [#allocation3], %s175_s21  ;;  %s512_s6 = scalar_lea.vmem (!%p155_p10), %s337_s28, 128 }
  0x13   : > { %p513_p12 = scmp.ne.s32.totalorder (!%p155_p10), %s337_s28, %s512_s6 }
  0x14   : > { %v506_v0 = vld [vmem:[%s731_s1 + $0x18] sm:$0xff]   ;;  %v590_v1 = vmov 0.0   ;;  %v507_v2 = vld [vmem:[%s731_s1 + $0x8] sm:$0xff]   ;;  %v508_v3 = vld [vmem:[%s731_s1 + $0x10] sm:$0xff]   ;;  %vm591_vm0 = vmmov 0   ;;  %s179_s7 = scalar_select %p178_p11, %s580_s15, 1  ;;  %v256_v9 = vlaneseq }
  0x15   : > { %433 = vmatprep.subr.bf16.mxu0 %v590_v1  ;;  %441 = vmatprep.subr.bf16.mxu1 %v590_v1  ;;  %v509_v4 = vld [vmem:[%s731_s1] sm:$0xff]   ;;  %vm212_vm1 = vcmask 261120   ;;  %p514_p13 = pnand %p513_p12, %p653_p4 }
  0x16   : > { %434 = vmatpush3.bf16.msra.mxu0 %v506_v0  ;;  %437 = vmatprep.mubr.msk.bf16.mxu0 %vm591_vm0, %v590_v1  ;;  %s426_s8 = sshll.u32 %s179_s7, 4  ;;  %v257_v10 = vshrl.u32 %v256_v9, 7  ;;  %v199_v11 = vld [vmem:[%s732_s2] sm:$0x1]  ;;  %s592_s7 = smov [#allocation2]  }
  0x17   : > { %442 = vmatpush3.bf16.msra.mxu1 %v507_v2  ;;  %435 = vmatprep.subr.bf16.mxu0 %v590_v1  ;;  %s182_s11 = scalar_lea.vmem %s730_s0, %s426_s8  ;;  %p515_p0 = pneg %p514_p13 }
  0x18   : > { %443 = vmatprep.subr.bf16.mxu1 %v590_v1  ;;  %445 = vmatprep.mubr.msk.bf16.mxu1 %vm591_vm0, %v590_v1  ;;  %v188_v5 = vld [vmem:[%s182_s11] sm:$0x1]  ;;  %v415_v6 = vld [vmem:[%s182_s11 + $0x1] sm:$0xff]  ;;  %v258_v12 = vsub.s32 0, %v257_v10  ;;  %s516_s15 = sshll.u32 %s592_s7, 4  ;;  %s517_s15 = int_to_ptr.vmem [resolvable:$false] %s516_s15 }
  0x19   : > { %v198_v7 = vpack.c.bf16 %v188_v5, %v188_v5  ;;  %v197_v8 = vpack.c.bf16 %v415_v6, %v415_v6  ;;  %s518_s8 = scalar_lea.vmem %s517_s15, 256  ;;  %p519_p1 = scmp.lt.s32.totalorder %s337_s28, %s517_s15 }
  0x1a   : > { %436 = vmatpush3.bf16.msra.mxu0 %v508_v3  ;;  %p520_p2 = scmp.lt.s32.totalorder %s518_s8, %s512_s6 }
  0x1b   : > { %444 = vmatpush3.bf16.msra.mxu1 %v509_v4 }
  0x1c   : > { %p521_p3 = por %p520_p2, %p519_p1 }
  0x1d   : > { %438 = vmatmul.mubr.msk.bf16.vlgmr.msra.gmra.mxu0 %vm212_vm1, %v198_v7 }
  0x1e   : > { %446 = vmatmul.mubr.msk.bf16.vlgmr.msra.gmra.mxu1 %vm212_vm1, %v197_v8  ;;  %p522_p5 = pnand %p521_p3, %p515_p0 }
  0xdd   : > { %v250_v13 = vpop.f32.mrf.mxu0 }
  0xde   : > { %v309_v14 = vpop.f32.mrf.mxu1  ;;  %v251_v15 = vadd.f32 %v250_v13, %v199_v11 }
  0xdf   : > { %v439_v16 = vpop.f32.mrf.mxu0 }
  0xe0   : > { %v447_v17 = vpop.f32.mrf.mxu1  ;;  %v259_v18 = vrot.slane %v251_v15, %v258_v12 }
  0xe1   : > { %v253_v19 = vpop.f32.mrf.mxu0 }
  0xe2   : > { %v312_v20 = vpop.f32.mrf.mxu1  ;;  %v310_v21 = vadd.f32 %v309_v14, %v259_v18 }
  0xe3   : > { %v440_v22 = vpop.f32.mrf.mxu0 }
  0xe4   : > { %v448_v23 = vpop.f32.mrf.mxu1  ;;  %v316_v24 = vmul.f32 0.70710677, %v310_v21  ;;  %v315_v26 = vmul.f32 0.5, %v310_v21 }
  0xe6   : > { %510 = verf.f32 %v316_v24 }
  0xf3   : > { %v511_v25 = vpop.eup %510 }
  0xf4   : > { %v318_v27 = vadd.f32 1.0, %v511_v25 }
  0xf6   : > { %v319_v28 = vmul.f32 %v318_v27, %v315_v26 }
  0xf8   : > { %320 = vst.msk [vmem:[%s177_s27] sm:$0xff] %vm212_vm1, %v319_v28 }
  0xf9   : > { %525 = shalt.err (!%p522_p5)
}
  0xfa   : > { %s526_s9 = scalar_lea.hbm %s334_s4, 128  ;;  %s530_s18 = scalar_lea.hbm %s733_s3, 256 }
  0xfb   : > { %p527_p6 = scmp.ne.s32.totalorder %s334_s4, %s526_s9  ;;  %p531_p10 = scmp.lt.s32.totalorder %s334_s4, %s733_s3 }
  0xfc   : > { %p532_p11 = scmp.lt.s32.totalorder %s530_s18, %s526_s9 }
  0xfd   : > { %p528_p7 = pnand %p527_p6, %p653_p4 }
  0xfe   : > { %p533_p12 = por %p532_p11, %p531_p10 }
  0xff   : > { %p529_p9 = pneg %p528_p7 }
 0x101   : > { %p534_p13 = pnand %p533_p12, %p529_p9 }
 0x103   : > { %537 = shalt.err (!%p534_p13)
}
 0x104   : > { %449 = dma.vmem_to_hbm [thread:$0]  (%p653_p4), %s337_s28, 128, %s334_s4, %s322_s5  }
 0x105 PF: > { %p455_p0 = scmp.ge.s32.totalorder %s588_s17, 2  ;;  %s348_s23 = sand.u32 1, %s568_s12  }
 0x106   : > { %s349_s26 = scalar_lea.sflag [#allocation3], %s348_s23 }
 0x107   : > { %p452_p1 = pnand %p455_p0, %p660_p8 }
 0x109   : > { %p453_p2 = pneg %p452_p1 }
 0x10b   : > { %563 = dma.done.wait (%p453_p2), %s349_s26, 128  }
 0x10c   : > { %565 = vsyncadd (%p453_p2), %s349_s26, 4294967168  ;;  %s16_s17 = sadd.s32 1, %s588_s17   ;;  %s736_s12 = smov %s572_s13 }
 0x10d   : > { %p13_p3 = scmp.ge.s32.totalorder %s16_s17, 4   ;;  %s737_s13 = smov %s576_s14 }
 0x10e   : > { %s738_s14 = smov %s666_s25  ;;  %s739_s15 = smov %s584_s16 }
 0x10f   : > { %s740_s16 = smov %s742_s20  ;;  %15 = sbr.rel (!%p13_p3) target bundleno = 4 (0x4), region = 68 }
 0x114   :  { %354 = vsyncpa [#allocation3], 1 }
 0x115   :  { %356 = vsyncpa [#allocation3 + $0x1], 1 }

</bundles_post_ra>
